<compile_context>
chip_gen: v6e
topology: v6e:2x2x1
jax: 0.10.0
libtpu: 0.0.40
codegen_flags: <defaults>
</compile_context>

<pallas_src>
import numpy as np
import jax
import jax.numpy as jnp
from jax.experimental import pallas as pl
from jax.experimental.pallas import tpu as pltpu

LANE = 128


def _round_up(x, m):
    return ((x + m - 1) // m) * m


def _cdiv(a, b):
    return (a + b - 1) // b


def critic_kernel(x_ref, xw1_ref, b1_ref, w2a_ref, xw2b_ref, b2_ref,
                  w3_ref, b3_ref, out_ref):
    # x is the fused [state | action] slab, already bf16 (cast host-side).
    x = x_ref[...]

    # fc1 + ReLU: x @ xw1 == state @ W1 (action rows of xw1 are zero).
    h1 = jnp.dot(x, xw1_ref[...], preferred_element_type=jnp.float32) + b1_ref[...]
    h1 = jnp.maximum(h1, 0.0)

    # fc2 over concat([h1, action]) == h1 @ W2a + action @ W2b
    # (state rows of xw2b are zero, so x @ xw2b == action @ W2b).
    h2 = (jnp.dot(h1.astype(jnp.bfloat16), w2a_ref[...],
                  preferred_element_type=jnp.float32)
          + jnp.dot(x, xw2b_ref[...], preferred_element_type=jnp.float32)
          + b2_ref[...])
    h2 = jnp.maximum(h2, 0.0)

    # fc3 (no activation) -> narrow fp32 store (valid Q-values in cols 0..1).
    out_ref[...] = (jnp.dot(h2.astype(jnp.bfloat16), w3_ref[...],
                            preferred_element_type=jnp.float32)
                    + b3_ref[...])


def prepare_params(params, state_size, action_size):
    """One-time weight prep (pad / split / fuse / bf16-cast). Keep OUT of the hot path."""
    w1, b1, w2, b2, w3, b3 = params
    fc1 = w1.shape[1]
    fc2 = w2.shape[1]
    n_out = w3.shape[1]
    sa = state_size + action_size

    fc1_p = _round_up(fc1, LANE)
    fc2_p = _round_up(fc2, LANE)
    out_p = max(_round_up(n_out, 8), 8)   # narrow fp32 output slab

    # Fused-input weights: the kernel streams a single [state|action] slab, so W1
    # (state rows only) and W2b (action rows only) are embedded in (sa, N) matrices
    # with zero rows for the unused half -> exact math, no in-kernel slicing/concat.
    xw1 = jnp.zeros((sa, fc1_p), jnp.float32).at[:state_size, :fc1].set(w1)
    w2a = w2[:fc1]
    w2b = w2[fc1:]
    w2ap = jnp.zeros((fc1_p, fc2_p), jnp.float32).at[:fc1, :fc2].set(w2a)
    xw2b = jnp.zeros((sa, fc2_p), jnp.float32).at[state_size:, :fc2].set(w2b)
    w3p = jnp.zeros((fc2_p, out_p), jnp.float32).at[:fc2, :n_out].set(w3)

    b1p = jnp.zeros((1, fc1_p), jnp.float32).at[:, :fc1].set(b1)
    b2p = jnp.zeros((1, fc2_p), jnp.float32).at[:, :fc2].set(b2)
    b3p = jnp.zeros((1, out_p), jnp.float32).at[:, :n_out].set(b3)

    return {
        "xw1": xw1.astype(jnp.bfloat16),
        "b1": b1p,
        "w2a": w2ap.astype(jnp.bfloat16),
        "xw2b": xw2b.astype(jnp.bfloat16),
        "b2": b2p,
        "w3": w3p.astype(jnp.bfloat16),
        "b3": b3p,
        "state_size": state_size,
        "action_size": action_size,
        "n_out": n_out,
    }


def critic_forward(state, action, prepared, *, block_b=512):
    """state: [B, state_size], action: [B, action_size] -> [B, 2]."""
    B = state.shape[0]
    state_size = prepared["state_size"]
    action_size = prepared["action_size"]
    n_out = prepared["n_out"]
    sa = state_size + action_size
    fc1_p = prepared["xw1"].shape[1]
    fc2_p = prepared["w2a"].shape[1]
    out_p = prepared["w3"].shape[1]

    # Single streamed bf16 activation slab: [state | action].
    x = jnp.concatenate([state, action], axis=1).astype(jnp.bfloat16)

    # Batch tiling:
    #  - tile is a multiple of 16 (bf16-friendly sublane packing),
    #  - large default tile (512) amortizes per-grid-step overhead,
    #  - >= 2 grid steps for nontrivial batches so v7x megacore shards the batch,
    #  - tile derived from ceil(B / n_tiles) so padding waste stays small.
    Bp0 = _round_up(B, 8)
    if Bp0 < 16:
        n_tiles, tb, Bp = 1, Bp0, Bp0
    else:
        n_tiles = max(_cdiv(Bp0, block_b), 2)
        tb = _round_up(_cdiv(Bp0, n_tiles), 16)
        Bp = tb * n_tiles
    if Bp != B:
        x = jnp.pad(x, ((0, Bp - B), (0, 0)))

    row = lambda i: (i, 0)     # activations/output: stream along batch
    const = lambda i: (0, 0)   # weights/biases: one resident block for all grid steps

    flops = 2 * Bp * (sa * fc1_p + fc1_p * fc2_p + sa * fc2_p + fc2_p * out_p)
    bytes_accessed = (Bp * sa * 2 + Bp * out_p * 4
                      + (prepared["xw1"].size + prepared["w2a"].size
                         + prepared["xw2b"].size + prepared["w3"].size) * 2
                      + (prepared["b1"].size + prepared["b2"].size
                         + prepared["b3"].size) * 4)

    out = pl.pallas_call(
        critic_kernel,
        out_shape=jax.ShapeDtypeStruct((Bp, out_p), jnp.float32),
        grid=(n_tiles,),
        in_specs=[
            pl.BlockSpec((tb, sa), row),
            pl.BlockSpec((sa, fc1_p), const),
            pl.BlockSpec((1, fc1_p), const),
            pl.BlockSpec((fc1_p, fc2_p), const),
            pl.BlockSpec((sa, fc2_p), const),
            pl.BlockSpec((1, fc2_p), const),
            pl.BlockSpec((fc2_p, out_p), const),
            pl.BlockSpec((1, out_p), const),
        ],
        out_specs=pl.BlockSpec((tb, out_p), row),
        compiler_params=pltpu.CompilerParams(
            dimension_semantics=("parallel",),
            vmem_limit_bytes=16 * 1024 * 1024,
        ),
        cost_estimate=pl.CostEstimate(flops=flops, transcendentals=0,
                                      bytes_accessed=bytes_accessed),
    )(x, prepared["xw1"], prepared["b1"], prepared["w2a"], prepared["xw2b"],
      prepared["b2"], prepared["w3"], prepared["b3"])

    # Strip batch padding and the lane padding of the 2-wide Q output.
    return out[:B, :n_out]


def init_params(key, state_size, action_size, fc1_units, fc2_units):
    """Deterministic synthetic init mirroring the PyTorch module's init ranges.

    hidden_init(layer) uses layer.weight.size()[0] (= out_features) as fan_in,
    which we reproduce for the weight ranges; fc3 weight uses +/-0.003.
    Biases use the PyTorch Linear default uniform(+/- 1/sqrt(in_features)).
    Weights are stored pre-transposed as [in_features, out_features].
    """
    ks = jax.random.split(key, 6)

    lim1 = 1.0 / np.sqrt(fc1_units)
    w1 = jax.random.uniform(ks[0], (state_size, fc1_units), jnp.float32, -lim1, lim1)
    b1 = jax.random.uniform(ks[1], (1, fc1_units), jnp.float32,
                            -1.0 / np.sqrt(state_size), 1.0 / np.sqrt(state_size))

    lim2 = 1.0 / np.sqrt(fc2_units)
    in2 = fc1_units + action_size
    w2 = jax.random.uniform(ks[2], (in2, fc2_units), jnp.float32, -lim2, lim2)
    b2 = jax.random.uniform(ks[3], (1, fc2_units), jnp.float32,
                            -1.0 / np.sqrt(in2), 1.0 / np.sqrt(in2))

    w3 = jax.random.uniform(ks[4], (fc2_units, 2), jnp.float32, -0.003, 0.003)
    b3 = jax.random.uniform(ks[5], (1, 2), jnp.float32,
                            -1.0 / np.sqrt(fc2_units), 1.0 / np.sqrt(fc2_units))

    return (w1, b1, w2, b2, w3, b3)


def reference_forward(state, action, params):
    w1, b1, w2, b2, w3, b3 = params
    h1 = jnp.maximum(state @ w1 + b1, 0.0)
    x = jnp.concatenate([h1, action], axis=1)
    h2 = jnp.maximum(x @ w2 + b2, 0.0)
    return h2 @ w3 + b3


if __name__ == "__main__":
    # Small config consistent with the module's forward
    batch = 8
    state_size = 16
    action_size = 4
    critic_fc1_units = 64
    critic_fc2_units = 32

    key = jax.random.PRNGKey(0)
    k_params, k_state, k_action = jax.random.split(key, 3)

    params = init_params(k_params, state_size, action_size,
                         critic_fc1_units, critic_fc2_units)
    # One-time weight prep hoisted out of the forward path.
    prepared = prepare_params(params, state_size, action_size)
    prepared = jax.tree_util.tree_map(
        lambda v: jax.block_until_ready(v) if isinstance(v, jax.Array) else v, prepared)

    state = jax.random.normal(k_state, (batch, state_size), jnp.float32)
    action = jax.random.normal(k_action, (batch, action_size), jnp.float32)

    out = critic_forward(state, action, prepared)
    out = jax.block_until_ready(out)

    ref = reference_forward(state, action, params)
    # bf16 matmul operands (fp32 accumulation) -> loosened tolerance vs fp32 reference.
    np.testing.assert_allclose(np.asarray(out), np.asarray(ref), rtol=2e-2, atol=1e-2)

    print("KERNEL_OK")
</pallas_src>

<mosaic_0001>
module attributes {stable_mosaic.version = 11 : i64} {
  func.func @critic_kernel(%arg0: i32, %arg1: memref<8x20xbf16, #tpu.memory_space<vmem>>, %arg2: memref<20x128xbf16, #tpu.memory_space<vmem>>, %arg3: memref<1x128xf32, #tpu.memory_space<vmem>>, %arg4: memref<128x128xbf16, #tpu.memory_space<vmem>>, %arg5: memref<20x128xbf16, #tpu.memory_space<vmem>>, %arg6: memref<1x128xf32, #tpu.memory_space<vmem>>, %arg7: memref<128x8xbf16, #tpu.memory_space<vmem>>, %arg8: memref<1x8xf32, #tpu.memory_space<vmem>>, %arg9: memref<8x8xf32, #tpu.memory_space<vmem>>) attributes {dimension_semantics = [#tpu.dimension_semantics<parallel>], iteration_bounds = array<i64: 1>, scalar_prefetch = 0 : i64, scratch_operands = 0 : i64, tpu.core_type = #tpu.core_type<tc>, window_params = [{transform_indices = @transform_0, window_bounds = array<i64: 8, 20>}, {pipeline_mode = #tpu.pipeline_mode<synchronous>, transform_indices = @transform_1, window_bounds = array<i64: 20, 128>}, {pipeline_mode = #tpu.pipeline_mode<synchronous>, transform_indices = @transform_2, window_bounds = array<i64: 1, 128>}, {pipeline_mode = #tpu.pipeline_mode<synchronous>, transform_indices = @transform_3, window_bounds = array<i64: 128, 128>}, {pipeline_mode = #tpu.pipeline_mode<synchronous>, transform_indices = @transform_4, window_bounds = array<i64: 20, 128>}, {pipeline_mode = #tpu.pipeline_mode<synchronous>, transform_indices = @transform_5, window_bounds = array<i64: 1, 128>}, {pipeline_mode = #tpu.pipeline_mode<synchronous>, transform_indices = @transform_6, window_bounds = array<i64: 128, 8>}, {pipeline_mode = #tpu.pipeline_mode<synchronous>, transform_indices = @transform_7, window_bounds = array<i64: 1, 8>}, {transform_indices = @transform_8, window_bounds = array<i64: 8, 8>}]} {
    %c0 = arith.constant 0 : index
    %c0_0 = arith.constant 0 : index
    %0 = vector.load %arg1[%c0, %c0_0] : memref<8x20xbf16, #tpu.memory_space<vmem>>, vector<8x20xbf16>
    %c0_1 = arith.constant 0 : index
    %c0_2 = arith.constant 0 : index
    %1 = vector.load %arg2[%c0_1, %c0_2] : memref<20x128xbf16, #tpu.memory_space<vmem>>, vector<20x128xbf16>
    %cst = arith.constant dense<0.000000e+00> : vector<8x128xf32>
    %2 = tpu.matmul %0, %1, %cst {dimension_numbers = #tpu.dot_dimension_numbers<[1], [0], [0], [1], [0, 0, 1, 1], [], []>} : vector<8x20xbf16>, vector<20x128xbf16>, vector<8x128xf32> -> vector<8x128xf32>
    %c0_3 = arith.constant 0 : index
    %c0_4 = arith.constant 0 : index
    %3 = vector.load %arg3[%c0_3, %c0_4] : memref<1x128xf32, #tpu.memory_space<vmem>>, vector<1x128xf32>
    %4 = vector.broadcast %3 : vector<1x128xf32> to vector<8x128xf32>
    %5 = arith.addf %2, %4 : vector<8x128xf32>
    %cst_5 = arith.constant 0.000000e+00 : f32
    %6 = vector.broadcast %cst_5 : f32 to vector<8x128xf32>
    %7 = arith.maximumf %5, %6 : vector<8x128xf32>
    %8 = arith.truncf %7 : vector<8x128xf32> to vector<8x128xbf16>
    %c0_6 = arith.constant 0 : index
    %c0_7 = arith.constant 0 : index
    %9 = vector.load %arg4[%c0_6, %c0_7] : memref<128x128xbf16, #tpu.memory_space<vmem>>, vector<128x128xbf16>
    %cst_8 = arith.constant dense<0.000000e+00> : vector<8x128xf32>
    %10 = tpu.matmul %8, %9, %cst_8 {dimension_numbers = #tpu.dot_dimension_numbers<[1], [0], [0], [1], [0, 0, 1, 1], [], []>} : vector<8x128xbf16>, vector<128x128xbf16>, vector<8x128xf32> -> vector<8x128xf32>
    %c0_9 = arith.constant 0 : index
    %c0_10 = arith.constant 0 : index
    %11 = vector.load %arg5[%c0_9, %c0_10] : memref<20x128xbf16, #tpu.memory_space<vmem>>, vector<20x128xbf16>
    %cst_11 = arith.constant dense<0.000000e+00> : vector<8x128xf32>
    %12 = tpu.matmul %0, %11, %cst_11 {dimension_numbers = #tpu.dot_dimension_numbers<[1], [0], [0], [1], [0, 0, 1, 1], [], []>} : vector<8x20xbf16>, vector<20x128xbf16>, vector<8x128xf32> -> vector<8x128xf32>
    %13 = arith.addf %10, %12 : vector<8x128xf32>
    %c0_12 = arith.constant 0 : index
    %c0_13 = arith.constant 0 : index
    %14 = vector.load %arg6[%c0_12, %c0_13] : memref<1x128xf32, #tpu.memory_space<vmem>>, vector<1x128xf32>
    %15 = vector.broadcast %14 : vector<1x128xf32> to vector<8x128xf32>
    %16 = arith.addf %13, %15 : vector<8x128xf32>
    %cst_14 = arith.constant 0.000000e+00 : f32
    %17 = vector.broadcast %cst_14 : f32 to vector<8x128xf32>
    %18 = arith.maximumf %16, %17 : vector<8x128xf32>
    %19 = arith.truncf %18 : vector<8x128xf32> to vector<8x128xbf16>
    %c0_15 = arith.constant 0 : index
    %c0_16 = arith.constant 0 : index
    %20 = vector.load %arg7[%c0_15, %c0_16] : memref<128x8xbf16, #tpu.memory_space<vmem>>, vector<128x8xbf16>
    %cst_17 = arith.constant dense<0.000000e+00> : vector<8x8xf32>
    %21 = tpu.matmul %19, %20, %cst_17 {dimension_numbers = #tpu.dot_dimension_numbers<[1], [0], [0], [1], [0, 0, 1, 1], [], []>} : vector<8x128xbf16>, vector<128x8xbf16>, vector<8x8xf32> -> vector<8x8xf32>
    %c0_18 = arith.constant 0 : index
    %c0_19 = arith.constant 0 : index
    %22 = vector.load %arg8[%c0_18, %c0_19] : memref<1x8xf32, #tpu.memory_space<vmem>>, vector<1x8xf32>
    %23 = vector.broadcast %22 : vector<1x8xf32> to vector<8x8xf32>
    %24 = arith.addf %21, %23 : vector<8x8xf32>
    %c0_20 = arith.constant 0 : index
    %c0_21 = arith.constant 0 : index
    %25 = vector.load %arg9[%c0_20, %c0_21] : memref<8x8xf32, #tpu.memory_space<vmem>>, vector<8x8xf32>
    tpu.vector_store %arg9[%c0_20, %c0_21], %24 {strides = array<i32>} : memref<8x8xf32, #tpu.memory_space<vmem>>, vector<8x8xf32>,
    return
  }
  func.func @transform_0(%arg0: i32) -> (i32, i32) {
    %c0_i32 = arith.constant 0 : i32
    %c0_i32_0 = arith.constant 0 : i32
    return %arg0, %c0_i32 : i32, i32
  }
  func.func @transform_1(%arg0: i32) -> (i32, i32) {
    %c0_i32 = arith.constant 0 : i32
    %c0_i32_0 = arith.constant 0 : i32
    %c0_i32_1 = arith.constant 0 : i32
    return %c0_i32, %c0_i32_0 : i32, i32
  }
  func.func @transform_2(%arg0: i32) -> (i32, i32) {
    %c0_i32 = arith.constant 0 : i32
    %c0_i32_0 = arith.constant 0 : i32
    %c0_i32_1 = arith.constant 0 : i32
    return %c0_i32, %c0_i32_0 : i32, i32
  }
  func.func @transform_3(%arg0: i32) -> (i32, i32) {
    %c0_i32 = arith.constant 0 : i32
    %c0_i32_0 = arith.constant 0 : i32
    %c0_i32_1 = arith.constant 0 : i32
    return %c0_i32, %c0_i32_0 : i32, i32
  }
  func.func @transform_4(%arg0: i32) -> (i32, i32) {
    %c0_i32 = arith.constant 0 : i32
    %c0_i32_0 = arith.constant 0 : i32
    %c0_i32_1 = arith.constant 0 : i32
    return %c0_i32, %c0_i32_0 : i32, i32
  }
  func.func @transform_5(%arg0: i32) -> (i32, i32) {
    %c0_i32 = arith.constant 0 : i32
    %c0_i32_0 = arith.constant 0 : i32
    %c0_i32_1 = arith.constant 0 : i32
    return %c0_i32, %c0_i32_0 : i32, i32
  }
  func.func @transform_6(%arg0: i32) -> (i32, i32) {
    %c0_i32 = arith.constant 0 : i32
    %c0_i32_0 = arith.constant 0 : i32
    %c0_i32_1 = arith.constant 0 : i32
    return %c0_i32, %c0_i32_0 : i32, i32
  }
  func.func @transform_7(%arg0: i32) -> (i32, i32) {
    %c0_i32 = arith.constant 0 : i32
    %c0_i32_0 = arith.constant 0 : i32
    %c0_i32_1 = arith.constant 0 : i32
    return %c0_i32, %c0_i32_0 : i32, i32
  }
  func.func @transform_8(%arg0: i32) -> (i32, i32) {
    %c0_i32 = arith.constant 0 : i32
    %c0_i32_0 = arith.constant 0 : i32
    return %arg0, %c0_i32 : i32, i32
  }
}

</mosaic_0001>

<bundles_post_ra>
// kernel: tpu_custom_call.1
= control target key start
LH: loop header
LB: loop body
LE: loop exit
PB: predicated region body
PF: predicated region fallthrough
CT: control target
= control target key end

     0   :  { %13 = vsyncpa [#allocation3], 0  ;;  %s776_s0 = inlined_call_operand.vmem [shape: bf16[8,20], index: 0, kind: input, shape index: {}]   ;;  %s777_s1 = inlined_call_operand.hbm [shape: bf16[20,128], index: 1, kind: input, shape index: {}]   ;;  %s778_s2 = inlined_call_operand.vmem [shape: f32[1,128], index: 2, kind: input, shape index: {}]   ;;  %s779_s3 = inlined_call_operand.vmem [shape: bf16[128,128], index: 3, kind: input, shape index: {}]   ;;  %s780_s4 = inlined_call_operand.hbm [shape: bf16[20,128], index: 4, kind: input, shape index: {}]   ;;  %s781_s5 = inlined_call_operand.vmem [shape: f32[1,128], index: 5, kind: input, shape index: {}]   ;;  %s782_s6 = inlined_call_operand.vmem [shape: bf16[128,8], index: 6, kind: input, shape index: {}]   ;;  %s783_s7 = inlined_call_operand.vmem [shape: f32[1,8], index: 7, kind: input, shape index: {}]   ;;  %s784_s8 = inlined_call_operand.hbm [shape: f32[8,8], index: 8, kind: output, shape index: {}]  }
   0x1   :  { %14 = vsyncpa [#allocation6], 0 }
   0x2   :  { %15 = vsyncpa [#allocation4], 0  ;;  %s625_s27 = smov [#allocation2]  }
   0x3   :  { %s23_s28 = sshll.u32 %s625_s27, 4  ;;  %s24_s28 = int_to_ptr.vmem [resolvable:$true] %s23_s28 }
   0x4   :  { %s567_s29 = scalar_lea.vmem %s24_s28, 192  ;;  %p572_p1 = scmp.lt.s32.totalorder %s24_s28, %s24_s28 }
   0x5   :  { %p568_p0 = scmp.ne.s32.totalorder %s24_s28, %s567_s29  ;;  %p573_p2 = scmp.lt.s32.totalorder %s567_s29, %s567_s29 }
   0x7   :  { %p574_p3 = por %p573_p2, %p572_p1 }
   0x9   :  { %p575_p4 = pnand %p574_p3, %p568_p0 }
   0xb   :  { %578 = shalt.err (!%p575_p4)
}
   0xc   :  { %s626_s30 = smov 64   ;;  %s627_s9 = smov 4  }
   0xd   :  { %29 = dma.hbm_to_vmem [thread:$0]  %s777_s1, 192, %s24_s28, [#allocation3], %s626_s30, %s626_s30, %s627_s9  }
   0xe   :  { %s628_s12 = smov [#allocation5]  }
   0xf   :  { %s39_s13 = sshll.u32 %s628_s12, 4  ;;  %s40_s13 = int_to_ptr.vmem [resolvable:$true] %s39_s13 }
  0x10   :  { %s587_s14 = scalar_lea.vmem %s40_s13, 192  ;;  %p592_p6 = scmp.lt.s32.totalorder %s40_s13, %s40_s13 }
  0x11   :  { %p588_p5 = scmp.ne.s32.totalorder %s40_s13, %s587_s14  ;;  %p593_p7 = scmp.lt.s32.totalorder %s587_s14, %s587_s14 }
  0x13   :  { %p594_p8 = por %p593_p7, %p592_p6 }
  0x15   :  { %p595_p9 = pnand %p594_p8, %p588_p5 }
  0x17   :  { %598 = shalt.err (!%p595_p9)
}
  0x18   :  { %45 = dma.hbm_to_vmem [thread:$0]  %s780_s4, 192, %s40_s13, [#allocation6], %s626_s30, %s626_s30, %s627_s9  }
  0x19   :  { %619 = dma.done.wait [#allocation3], 192  }
  0x1a   :  { %620 = vsyncadd [#allocation3], 4294967104 }
  0x1b   :  { %621 = dma.done.wait [#allocation6], 192  }
  0x1c   :  { %622 = vsyncadd [#allocation6], 4294967104  ;;  %v629_v0 = vmov 0.0   ;;  %vm630_vm0 = vmmov 0   ;;  %vm83_vm1 = vcmask 1041408   ;;  %v540_v3 = vld [vmem:[#allocation2] sm:$0xff]  }
  0x1d   :  { %476 = vmatprep.subr.bf16.mxu0 %v629_v0  ;;  %480 = vmatprep.mubr.msk.bf16.mxu0 %vm630_vm0, %v629_v0  ;;  %v539_v1 = vld [vmem:[#allocation2 + $0x8] ss:$0 sps:$4 sm:$0x33]   ;;  %vm79_vm2 = vcmask 162816   ;;  %v59_v4 = vld [vmem:[%s776_s0] sm:$0xf] }
  0x1e   :  { %484 = vmatprep.subr.bf16.mxu1 %v629_v0  ;;  %488 = vmatprep.mubr.msk.bf16.mxu1 %vm630_vm0, %v629_v0  ;;  %v85_v2 = vsel %vm83_vm1, %v539_v1, 0  ;;  %v541_v5 = vld [vmem:[%s779_s3 + $0x38] sm:$0xff]   ;;  %v546_v6 = vld [vmem:[#allocation5 + $0x8] ss:$0 sps:$4 sm:$0x33]   ;;  %v548_v9 = vld [vmem:[#allocation5] sm:$0xff]  }
  0x1f   :  { %477 = vmatpush3.bf16.msra.mxu0 %v85_v2  ;;  %v542_v7 = vld [vmem:[%s779_s3 + $0x30] sm:$0xff]   ;;  %v158_v8 = vsel %vm83_vm1, %v546_v6, 0  ;;  %v543_v10 = vld [vmem:[%s779_s3 + $0x28] sm:$0xff]   ;;  %v544_v11 = vld [vmem:[%s779_s3 + $0x20] sm:$0xff]   ;;  %s631_s27 = smov [#allocation7]   ;;  %vm409_vm3 = vcmask 64512  }
  0x20   :  { %478 = vmatprep.subr.bf16.mxu0 %v629_v0  ;;  %485 = vmatpush3.bf16.msra.mxu1 %v158_v8  ;;  %v545_v12 = vld [vmem:[%s779_s3 + $0x18] sm:$0xff]   ;;  %v547_v13 = vld [vmem:[%s779_s3 + $0x10] sm:$0xff]   ;;  %v549_v14 = vld [vmem:[%s779_s3 + $0x8] sm:$0xff]  }
  0x21   :  { %486 = vmatprep.subr.bf16.mxu1 %v629_v0  ;;  %v550_v15 = vld [vmem:[%s779_s3] sm:$0xff]   ;;  %v551_v16 = vld [vmem:[%s782_s6 + $0x38] sm:$0xff]   ;;  %v552_v17 = vld [vmem:[%s782_s6 + $0x30] sm:$0xff]  }
  0x22   :  { %v553_v18 = vld [vmem:[%s782_s6 + $0x28] sm:$0xff]   ;;  %v554_v19 = vld [vmem:[%s782_s6 + $0x20] sm:$0xff]   ;;  %v555_v20 = vld [vmem:[%s782_s6 + $0x18] sm:$0xff]  }
  0x23   :  { %479 = vmatpush3.bf16.msra.mxu0 %v540_v3  ;;  %v556_v21 = vld [vmem:[%s782_s6 + $0x10] sm:$0xff]   ;;  %v427_v22 = vld [vmem:[%s778_s2] ss:$0 sm:$0xff]  ;;  %v557_v34 = vld [vmem:[%s782_s6 + $0x8] sm:$0xff]  }
  0x24   :  { %492 = vmatprep.subr.bf16.mxu0 %v629_v0  ;;  %487 = vmatpush3.bf16.msra.mxu1 %v548_v9  ;;  %v558_v35 = vld [vmem:[%s782_s6] sm:$0xff]   ;;  %s417_s6 = sshll.u32 %s631_s27, 4  ;;  %s418_s6 = int_to_ptr.vmem [resolvable:$true] %s417_s6 }
  0x25   :  { %512 = vmatprep.subr.bf16.mxu1 %v629_v0  ;;  %v442_v37 = vld [vmem:[%s781_s5] ss:$0 sm:$0xff]  ;;  %s599_s5 = scalar_lea.vmem %s418_s6, 128  ;;  %p604_p11 = scmp.lt.s32.totalorder %s418_s6, %s418_s6 }
  0x26   :  { %481 = vmatmul.mubr.msk.bf16.vlgmr.msra.gmra.mxu0 %vm79_vm2, %v59_v4  ;;  %v443_v45 = vld [vmem:[%s783_s7] ss:$0 sm:$0xff]  ;;  %p600_p10 = scmp.ne.s32.totalorder %s418_s6, %s599_s5  ;;  %p605_p12 = scmp.lt.s32.totalorder %s599_s5, %s599_s5 }
  0x27   :  { %493 = vmatpush3.bf16.msra.mxu0 %v541_v5  ;;  %508 = vmatprep.mubr.msk.bf16.mxu0 %vm630_vm0, %v629_v0 }
  0x28   :  { %494 = vmatprep.subr.bf16.mxu0 %v629_v0  ;;  %489 = vmatmul.mubr.msk.bf16.vlgmr.msra.gmra.mxu1 %vm79_vm2, %v59_v4  ;;  %p606_p13 = por %p605_p12, %p604_p11 }
  0x29   :  { %528 = vmatprep.mubr.msk.bf16.mxu1 %vm630_vm0, %v629_v0  ;;  %513 = vmatpush3.bf16.msra.mxu1 %v551_v16 }
  0x2a   :  { %514 = vmatprep.subr.bf16.mxu1 %v629_v0  ;;  %p607_p0 = pnand %p606_p13, %p600_p10 }
  0x2b   :  { %495 = vmatpush3.bf16.msra.mxu0 %v542_v7 }
  0x2c   :  { %496 = vmatprep.subr.bf16.mxu0 %v629_v0 }
  0x2d   :  { %515 = vmatpush3.bf16.msra.mxu1 %v552_v17 }
  0x2e   :  { %516 = vmatprep.subr.bf16.mxu1 %v629_v0 }
  0x2f   :  { %497 = vmatpush3.bf16.msra.mxu0 %v543_v10 }
  0x30   :  { %498 = vmatprep.subr.bf16.mxu0 %v629_v0 }
  0x31   :  { %517 = vmatpush3.bf16.msra.mxu1 %v553_v18 }
  0x32   :  { %518 = vmatprep.subr.bf16.mxu1 %v629_v0 }
  0x33   :  { %499 = vmatpush3.bf16.msra.mxu0 %v544_v11 }
  0x34   :  { %500 = vmatprep.subr.bf16.mxu0 %v629_v0 }
  0x35   :  { %519 = vmatpush3.bf16.msra.mxu1 %v554_v19 }
  0x36   :  { %520 = vmatprep.subr.bf16.mxu1 %v629_v0 }
  0x37   :  { %501 = vmatpush3.bf16.msra.mxu0 %v545_v12 }
  0x38   :  { %502 = vmatprep.subr.bf16.mxu0 %v629_v0 }
  0x39   :  { %521 = vmatpush3.bf16.msra.mxu1 %v555_v20 }
  0x3a   :  { %522 = vmatprep.subr.bf16.mxu1 %v629_v0 }
  0x3b   :  { %503 = vmatpush3.bf16.msra.mxu0 %v547_v13 }
  0x3c   :  { %504 = vmatprep.subr.bf16.mxu0 %v629_v0 }
  0x3d   :  { %523 = vmatpush3.bf16.msra.mxu1 %v556_v21 }
  0x3e   :  { %524 = vmatprep.subr.bf16.mxu1 %v629_v0 }
  0x3f   :  { %505 = vmatpush3.bf16.msra.mxu0 %v549_v14 }
  0x40   :  { %506 = vmatprep.subr.bf16.mxu0 %v629_v0 }
  0x41   :  { %525 = vmatpush3.bf16.msra.mxu1 %v557_v34 }
  0x42   :  { %526 = vmatprep.subr.bf16.mxu1 %v629_v0 }
  0x43   :  { %507 = vmatpush3.bf16.msra.mxu0 %v550_v15 }
  0x45   :  { %527 = vmatpush3.bf16.msra.mxu1 %v558_v35 }
  0xe6   :  { %v121_v23 = vpop.f32.mrf.mxu0 }
  0xe7   :  { %v122_v24 = vadd.f32 %v427_v22, %v121_v23 }
  0xe8   :  { %v482_v25 = vpop.f32.mrf.mxu0  ;;  %v194_v30 = vpop.f32.mrf.mxu1 }
  0xe9   :  { %v127_v26 = vmax.f32 %v122_v24, 0.0 }
  0xea   :  { %v124_v27 = vpop.f32.mrf.mxu0  ;;  %v490_v31 = vpop.f32.mrf.mxu1 }
  0xeb   :  { %v128_v28 = vpack.c.bf16 %v127_v26, %v127_v26 }
  0xec   :  { %v483_v29 = vpop.f32.mrf.mxu0  ;;  %v197_v32 = vpop.f32.mrf.mxu1 }
  0xed   :  { %509 = vmatmul.mubr.bf16.vlgmr.msra.gmra.mxu0 %v128_v28 }
  0xee   :  { %v491_v33 = vpop.f32.mrf.mxu1 }
 0x1ad   :  { %v282_v36 = vpop.f32.mrf.mxu0 }
 0x1ae   :  { %v283_v38 = vadd.f32 %v282_v36, %v194_v30 }
 0x1af   :  { %v510_v39 = vpop.f32.mrf.mxu0 }
 0x1b0   :  { %v295_v40 = vadd.f32 %v442_v37, %v283_v38 }
 0x1b1   :  { %v285_v41 = vpop.f32.mrf.mxu0 }
 0x1b2   :  { %v296_v42 = vmax.f32 %v295_v40, 0.0 }
 0x1b3   :  { %v511_v43 = vpop.f32.mrf.mxu0 }
 0x1b4   :  { %v297_v44 = vpack.c.bf16 %v296_v42, %v296_v42 }
 0x1b6   :  { %529 = vmatmul.mubr.bf16.vlgmr.msra.gmra.mxu1 %v297_v44 }
 0x276   :  { %v403_v46 = vpop.f32.mrf.mxu1 }
 0x277   :  { %v404_v47 = vadd.f32 %v443_v45, %v403_v46 }
 0x278   :  { %v530_v48 = vpop.f32.mrf.mxu1 }
 0x279   :  { %410 = vst.msk [vmem:[#allocation7] sm:$0xff] %vm409_vm3, %v404_v47 }
 0x27a   :  { %v406_v49 = vpop.f32.mrf.mxu1 }
 0x27b   :  { %610 = shalt.err (!%p607_p0)
}
 0x27c   :  { %420 = dma.vmem_to_hbm [thread:$0]  %s418_s6, 128, %s784_s8, [#allocation4]   ;;  %v531_v50 = vpop.f32.mrf.mxu1 }
 0x27d   :  { %623 = dma.done.wait [#allocation4], 128  }
 0x27e   :  { %624 = vsyncadd [#allocation4], 4294967168 }
 0x27f   :  { %424 = vsyncpa [#allocation3], 1 }
 0x280   :  { %425 = vsyncpa [#allocation6], 1 }
 0x281   :  { %426 = vsyncpa [#allocation4], 1 }

</bundles_post_ra>
